<compile_context>
chip_gen: v5e
topology: v5e:2x2
jax: 0.10.0
libtpu: 0.0.40
codegen_flags: <defaults>
</compile_context>

<pallas_src>
import functools

import jax
import jax.numpy as jnp
from jax import lax
from jax.experimental import pallas as pl
from jax.experimental.pallas import tpu as pltpu

# Constants matching the PyTorch module defaults
_TEMPERATURE = 0.1        # TaskOrientedPhenotypeLearning(temperature=0.1)
_BASE_TEMPERATURE = 0.07  # SupConLoss default base_temperature
_ALPHA = 5.0              # phenotype alpha
_TOPL_WEIGHT = 0.03       # LossFunction: loss += 0.03 * topl
_OUT_LANES = 128          # lane-dense per-tile partial-sum slab
_MAX_ROW_TILE = 128       # query-row tile (multiple of 8; 128-aligned for the MXU)
_USE_BF16_MATMUL = False  # v6e/v7x: bf16 MXU operands (verify tolerance before enabling)


def _apply_alpha(sim, alpha):
    # cat_sim[cat_sim > 1] *= alpha ; cat_sim[cat_sim < 1] /= alpha
    return jnp.where(sim > 1.0, sim * alpha,
                     jnp.where(sim < 1.0, sim * (1.0 / alpha), sim))


def _fused_loss_kernel(logits_ref, lab_col_ref, lab_row_ref,
                       feat_ref, feat_t_ref,
                       cp_ref, cpt_ref, cnp_ref, cnpt_ref,
                       out_ref, *,
                       batch_size, temperature, base_temperature, alpha,
                       use_bf16_matmul):
    f32 = jnp.float32
    Bq = feat_ref.shape[0]            # rows handled by this grid step
    B = feat_t_ref.shape[1]           # full batch (contrast/key dimension)
    C = logits_ref.shape[1]
    inv_b = 1.0 / batch_size
    row_start = pl.program_id(0) * Bq

    # ---------------- Cross entropy (partial sum over this row tile) ----------------
    logits = logits_ref[...].astype(f32)                          # (Bq, C)
    lab_col = lab_col_ref[...].astype(jnp.int32)                  # (Bq, 1)
    class_iota = lax.broadcasted_iota(jnp.int32, (Bq, C), 1)
    m = jnp.max(logits, axis=1, keepdims=True)
    lse = jnp.log(jnp.sum(jnp.exp(logits - m), axis=1, keepdims=True)) + m
    picked = jnp.sum(jnp.where(class_iota == lab_col, logits, 0.0),
                     axis=1, keepdims=True)                       # logit at the label
    ce_part = jnp.sum(lse - picked)                               # scalar

    # ---------------- global row/col masks for this tile ----------------
    r_iota = lax.broadcasted_iota(jnp.int32, (Bq, B), 0) + row_start
    c_iota = lax.broadcasted_iota(jnp.int32, (Bq, B), 1)
    off_diag = (r_iota != c_iota).astype(f32)                     # (Bq, B)

    # ---------------- phenotype scale factors ----------------
    # Per-feature scalar stats are hoisted out of the (Bq,B) loops and computed
    # vectorized from the tiny (n, B) tables.
    cpt = cpt_ref[...].astype(f32)                                # (NC, B)
    cp = cp_ref[...].astype(f32)                                  # (Bq, NC)
    n_cat = cpt.shape[0]
    cat_valid = (cpt != -1.0).astype(f32)                         # (NC, B)
    cat_nvalid = jnp.sum(cat_valid, axis=1, keepdims=True)        # (NC, 1)
    cat_w = (cat_nvalid * inv_b) * (cat_nvalid > 1.0).astype(f32)  # confidence * gate

    cat_sim = jnp.ones((Bq, B), f32)
    # tiny static unroll; switch to lax.fori_loop(..., unroll=True) if n_cat grows
    for k in range(n_cat):
        fc = cp[:, k:k + 1]                                       # (Bq, 1)
        fr = cpt[k:k + 1, :]                                      # (1, B)
        pair = (fc != -1.0).astype(f32) * cat_valid[k:k + 1, :]   # valid pairs (incl. diag)
        eq = (fc == fr).astype(f32)
        cat_sim = cat_sim + eq * pair * cat_w[k:k + 1, :]
    cat_sim = _apply_alpha(cat_sim * (1.0 / n_cat), alpha)

    cnpt = cnpt_ref[...].astype(f32)                              # (NF, B)
    cnp = cnp_ref[...].astype(f32)                                # (Bq, NF)
    n_cont = cnpt.shape[0]
    cn_valid = (cnpt != -1.0).astype(f32)
    cn_nvalid = jnp.sum(cn_valid, axis=1, keepdims=True)          # (NF, 1)
    cn_w = (cn_nvalid * inv_b) * (cn_nvalid > 1.0).astype(f32)
    cn_mean = (jnp.sum(cnpt * cn_valid, axis=1, keepdims=True)
               / jnp.maximum(cn_nvalid, 1.0))
    # torch.std is unbiased (ddof=1)
    cn_var = (jnp.sum(((cnpt - cn_mean) ** 2) * cn_valid, axis=1, keepdims=True)
              / jnp.maximum(cn_nvalid - 1.0, 1.0))
    cn_inv_std = 1.0 / (jnp.sqrt(cn_var) + 1e-6)

    cont_sim = jnp.ones((Bq, B), f32)
    for k in range(n_cont):
        fc = cnp[:, k:k + 1]                                      # (Bq, 1)
        fr = cnpt[k:k + 1, :]                                     # (1, B)
        pair = (fc != -1.0).astype(f32) * cn_valid[k:k + 1, :] * off_diag
        zc = (fc - cn_mean[k:k + 1, :]) * cn_inv_std[k:k + 1, :]
        zr = (fr - cn_mean[k:k + 1, :]) * cn_inv_std[k:k + 1, :]
        dist = ((zc - zr) ** 2) * pair
        # exp(0) = 1 at masked/diagonal slots -> adds confidence there (matches reference)
        cont_sim = cont_sim + jnp.exp(-0.5 * dist) * cn_w[k:k + 1, :]
    cont_sim = _apply_alpha(cont_sim * (1.0 / n_cont), alpha)

    scale = cat_sim * cont_sim                                    # (Bq, B)

    # ---------------- SupCon supervised term (unsup term is identically 0) ----------
    x = feat_ref[...].astype(f32)                                 # (Bq, D) anchors
    xt = feat_t_ref[...].astype(f32)                              # (D, B)  contrast (natural MXU layout)
    # F.normalize: v / max(||v||, 1e-12); exact sqrt/divide for reference parity
    xn = x / jnp.maximum(jnp.sqrt(jnp.sum(x * x, axis=1, keepdims=True)), 1e-12)
    ynT = xt / jnp.maximum(jnp.sqrt(jnp.sum(xt * xt, axis=0, keepdims=True)), 1e-12)

    if use_bf16_matmul:
        adc = jnp.dot(xn.astype(jnp.bfloat16), ynT.astype(jnp.bfloat16),
                      preferred_element_type=f32) * (1.0 / temperature)
    else:
        adc = jnp.dot(xn, ynT, preferred_element_type=f32) * (1.0 / temperature)

    logits_max = jnp.max(adc, axis=1, keepdims=True)
    lg = (adc - logits_max) * scale    # scale applied AFTER max-sub (reference order)

    lab_row = lab_row_ref[...].astype(jnp.int32)                  # (1, B)
    mask_sup = (lab_col == lab_row).astype(f32) * off_diag

    denom = jnp.sum(jnp.exp(lg) * off_diag, axis=1, keepdims=True)  # > 0 for B >= 2
    log_prob = lg - jnp.log(denom)

    pos = jnp.sum(mask_sup, axis=1, keepdims=True)
    pos = jnp.where(pos < 1e-6, 1.0, pos)
    # exact divide (approx EUP reciprocal perturbs parity with the torch reference)
    mean_log_prob_pos = jnp.sum(mask_sup * log_prob, axis=1, keepdims=True) / pos
    topl_part = jnp.sum(-(temperature / base_temperature) * mean_log_prob_pos)

    # single unmasked lane-dense store of the per-tile partial sums:
    #   lane 0 = sum of CE nll over this tile's rows, lane 1 = sum of TOPL row losses
    lane = lax.broadcasted_iota(jnp.int32, out_ref.shape, 1)
    out_ref[...] = jnp.where(lane == 0, ce_part,
                             jnp.where(lane == 1, topl_part, 0.0)).astype(f32)


def _vmem_limit_bytes(B, Bq, C, D, n_cat, n_cont):
    # input/output block bytes (f32-conservative), double-buffered by the pipeline
    blocks = (Bq * C + Bq + B + Bq * D + D * B
              + Bq * n_cat + n_cat * B + Bq * n_cont + n_cont * B
              + _OUT_LANES) * 4 * 2
    # live (Bq, B) f32 intermediates in the body (scale/adc/lg/masks/...), conservative
    interm = Bq * B * 4 * 12
    est = blocks + interm + (2 << 20)           # headroom for compiler scratch
    # floor at a comfortable default, cap well under v7x's 64 MiB physical VMEM
    return int(min(max(est, 16 << 20), 48 << 20))


@jax.jit
def loss_function_forward(logits, label, features, cp, cnp):
    """LossFunction.forward for model='generic', fusion='dpl', world_size=1."""
    B, C = logits.shape
    D = features.shape[1]
    n_cat = cp.shape[1]
    n_cont = cnp.shape[1]

    row_tile = B if B <= _MAX_ROW_TILE else _MAX_ROW_TILE
    assert B % row_tile == 0, "batch must be a multiple of the row tile"
    num_rt = B // row_tile

    lab = label.astype(jnp.int32)
    lab_col = lab.reshape(B, 1)
    lab_row = lab.reshape(1, B)
    # Inputs stay in their native dtype (bf16 stays bf16 over the DMA); widened in-kernel.
    feat_t = jnp.transpose(features)   # (D, B): contrast operand in MXU-natural layout
    cpt = jnp.transpose(cp)            # (NC, B)
    cnpt = jnp.transpose(cnp)          # (NF, B)

    kern = functools.partial(_fused_loss_kernel,
                             batch_size=B,
                             temperature=_TEMPERATURE,
                             base_temperature=_BASE_TEMPERATURE,
                             alpha=_ALPHA,
                             use_bf16_matmul=_USE_BF16_MATMUL)

    parts = pl.pallas_call(
        kern,
        out_shape=jax.ShapeDtypeStruct((num_rt, _OUT_LANES), jnp.float32),
        grid=(num_rt,),
        in_specs=[
            pl.BlockSpec((row_tile, C), lambda i: (i, 0)),        # logits row tile
            pl.BlockSpec((row_tile, 1), lambda i: (i, 0)),        # labels (column, tile)
            pl.BlockSpec((1, B), lambda i: (0, 0)),               # labels (row, full)
            pl.BlockSpec((row_tile, D), lambda i: (i, 0)),        # features row tile (anchors)
            pl.BlockSpec((D, B), lambda i: (0, 0)),               # features^T (contrast side)
            pl.BlockSpec((row_tile, n_cat), lambda i: (i, 0)),    # categorical phenotypes tile
            pl.BlockSpec((n_cat, B), lambda i: (0, 0)),           # categorical phenotypes^T
            pl.BlockSpec((row_tile, n_cont), lambda i: (i, 0)),   # continuous phenotypes tile
            pl.BlockSpec((n_cont, B), lambda i: (0, 0)),          # continuous phenotypes^T
        ],
        out_specs=pl.BlockSpec((1, _OUT_LANES), lambda i: (i, 0)),
        compiler_params=pltpu.CompilerParams(
            dimension_semantics=("parallel",),                    # megacore row sharding (v7x)
            vmem_limit_bytes=_vmem_limit_bytes(B, row_tile, C, D, n_cat, n_cont)),
    )(logits, lab_col, lab_row, features, feat_t, cp, cpt, cnp, cnpt)

    ce = jnp.sum(parts[:, 0]) / B
    topl = jnp.sum(parts[:, 1]) / B
    # TODO(synk): fbnetgen / braingnn / bolt branches and world_size>1 GatherLayer
    # (distributed all-gather) are not exercised in this synthetic config.
    return ce + _TOPL_WEIGHT * topl


if __name__ == "__main__":
    key = jax.random.PRNGKey(0)
    k1, k2, k3, k4, k5, k6 = jax.random.split(key, 6)

    B, D, C = 8, 32, 2           # batch, feature dim, num classes
    N_CAT, N_CONT = 3, 2         # phenotype feature counts

    features = jax.random.normal(k1, (B, D), dtype=jnp.float32)
    logits = jax.random.normal(k2, (B, C), dtype=jnp.float32)
    label = jax.random.randint(k3, (B,), 0, C)

    # categorical phenotypes in {0,1,2} with some missing (-1)
    cp = jax.random.randint(k4, (B, N_CAT), -1, 3).astype(jnp.float32)
    # continuous phenotypes with ~20% missing (-1)
    cnp_vals = jax.random.normal(k5, (B, N_CONT), dtype=jnp.float32)
    miss = jax.random.uniform(k6, (B, N_CONT)) < 0.2
    cnp = jnp.where(miss, -1.0, jnp.abs(cnp_vals) + 0.5)

    loss = loss_function_forward(logits, label, features, cp, cnp)
    loss = jax.block_until_ready(loss)
    assert jnp.isfinite(loss), "loss is not finite"
    print("KERNEL_OK")
</pallas_src>

<mosaic_0001>
module attributes {stable_mosaic.version = 11 : i64} {
  func.func @_fused_loss_kernel(%arg0: i32, %arg1: memref<8x2xf32, #tpu.memory_space<vmem>>, %arg2: memref<8x1xi32, #tpu.memory_space<vmem>>, %arg3: memref<1x8xi32, #tpu.memory_space<vmem>>, %arg4: memref<8x32xf32, #tpu.memory_space<vmem>>, %arg5: memref<32x8xf32, #tpu.memory_space<vmem>>, %arg6: memref<8x3xf32, #tpu.memory_space<vmem>>, %arg7: memref<3x8xf32, #tpu.memory_space<vmem>>, %arg8: memref<8x2xf32, #tpu.memory_space<vmem>>, %arg9: memref<2x8xf32, #tpu.memory_space<vmem>>, %arg10: memref<1x128xf32, #tpu.memory_space<vmem>>) attributes {dimension_semantics = [#tpu.dimension_semantics<parallel>], iteration_bounds = array<i64: 1>, scalar_prefetch = 0 : i64, scratch_operands = 0 : i64, tpu.core_type = #tpu.core_type<tc>, window_params = [{transform_indices = @transform_0, window_bounds = array<i64: 8, 2>}, {transform_indices = @transform_1, window_bounds = array<i64: 8, 1>}, {pipeline_mode = #tpu.pipeline_mode<synchronous>, transform_indices = @transform_2, window_bounds = array<i64: 1, 8>}, {transform_indices = @transform_3, window_bounds = array<i64: 8, 32>}, {pipeline_mode = #tpu.pipeline_mode<synchronous>, transform_indices = @transform_4, window_bounds = array<i64: 32, 8>}, {transform_indices = @transform_5, window_bounds = array<i64: 8, 3>}, {pipeline_mode = #tpu.pipeline_mode<synchronous>, transform_indices = @transform_6, window_bounds = array<i64: 3, 8>}, {transform_indices = @transform_7, window_bounds = array<i64: 8, 2>}, {pipeline_mode = #tpu.pipeline_mode<synchronous>, transform_indices = @transform_8, window_bounds = array<i64: 2, 8>}, {transform_indices = @transform_9, window_bounds = array<i64: 1, 128>}]} {
    %c8_i32 = arith.constant 8 : i32
    %0 = arith.muli %arg0, %c8_i32 : i32
    %c0 = arith.constant 0 : index
    %c0_0 = arith.constant 0 : index
    %1 = vector.load %arg1[%c0, %c0_0] : memref<8x2xf32, #tpu.memory_space<vmem>>, vector<8x2xf32>
    %c0_1 = arith.constant 0 : index
    %c0_2 = arith.constant 0 : index
    %2 = vector.load %arg2[%c0_1, %c0_2] : memref<8x1xi32, #tpu.memory_space<vmem>>, vector<8x1xi32>
    %3 = tpu.iota {dimensions = array<i32: 1>} : vector<8x2xi32>
    %cst = arith.constant dense<0xFF800000> : vector<8xf32>
    %4 = vector.multi_reduction <maximumf>, %1, %cst [1] : vector<8x2xf32> to vector<8xf32>
    %5 = vector.shape_cast %4 : vector<8xf32> to vector<8x1xf32>
    %6 = vector.broadcast %5 : vector<8x1xf32> to vector<8x2xf32>
    %7 = arith.subf %1, %6 : vector<8x2xf32>
    %8 = math.exp %7 : vector<8x2xf32>
    %cst_3 = arith.constant dense<0.000000e+00> : vector<8xf32>
    %9 = vector.multi_reduction <add>, %8, %cst_3 [1] : vector<8x2xf32> to vector<8xf32>
    %10 = vector.shape_cast %9 : vector<8xf32> to vector<8x1xf32>
    %11 = math.log %10 : vector<8x1xf32>
    %12 = arith.addf %11, %5 : vector<8x1xf32>
    %13 = vector.broadcast %2 : vector<8x1xi32> to vector<8x2xi32>
    %14 = arith.cmpi eq, %3, %13 : vector<8x2xi32>
    %cst_4 = arith.constant 0.000000e+00 : f32
    %15 = vector.broadcast %cst_4 : f32 to vector<8x2xf32>
    %16 = arith.select %14, %1, %15 : vector<8x2xi1>, vector<8x2xf32>
    %cst_5 = arith.constant dense<0.000000e+00> : vector<8xf32>
    %17 = vector.multi_reduction <add>, %16, %cst_5 [1] : vector<8x2xf32> to vector<8xf32>
    %18 = vector.shape_cast %17 : vector<8xf32> to vector<8x1xf32>
    %19 = arith.subf %12, %18 : vector<8x1xf32>
    %20 = vector.shape_cast %19 : vector<8x1xf32> to vector<1x8x1xf32>
    %cst_6 = arith.constant dense<0.000000e+00> : vector<1xf32>
    %21 = vector.multi_reduction <add>, %20, %cst_6 [1, 2] : vector<1x8x1xf32> to vector<1xf32>
    %22 = vector.shape_cast %21 : vector<1xf32> to vector<1x1x1xf32>
    %23 = vector.extract %22[0, 0, 0] : f32 from vector<1x1x1xf32>
    %24 = tpu.iota {dimensions = array<i32: 0>} : vector<8x8xi32>
    %25 = vector.broadcast %0 : i32 to vector<8x8xi32>
    %26 = arith.addi %24, %25 : vector<8x8xi32>
    %27 = tpu.iota {dimensions = array<i32: 1>} : vector<8x8xi32>
    %28 = arith.cmpi ne, %26, %27 : vector<8x8xi32>
    %29 = arith.extui %28 : vector<8x8xi1> to vector<8x8xi32>
    %30 = arith.sitofp %29 : vector<8x8xi32> to vector<8x8xf32>
    %c0_7 = arith.constant 0 : index
    %c0_8 = arith.constant 0 : index
    %31 = vector.load %arg7[%c0_7, %c0_8] : memref<3x8xf32, #tpu.memory_space<vmem>>, vector<3x8xf32>
    %c0_9 = arith.constant 0 : index
    %c0_10 = arith.constant 0 : index
    %32 = vector.load %arg6[%c0_9, %c0_10] : memref<8x3xf32, #tpu.memory_space<vmem>>, vector<8x3xf32>
    %cst_11 = arith.constant -1.000000e+00 : f32
    %33 = vector.broadcast %cst_11 : f32 to vector<3x8xf32>
    %34 = arith.cmpf one, %31, %33 : vector<3x8xf32>
    %35 = arith.extui %34 : vector<3x8xi1> to vector<3x8xi32>
    %36 = arith.sitofp %35 : vector<3x8xi32> to vector<3x8xf32>
    %cst_12 = arith.constant dense<0.000000e+00> : vector<3xf32>
    %37 = vector.multi_reduction <add>, %36, %cst_12 [1] : vector<3x8xf32> to vector<3xf32>
    %38 = vector.shape_cast %37 : vector<3xf32> to vector<3x1xf32>
    %cst_13 = arith.constant 1.250000e-01 : f32
    %39 = vector.broadcast %cst_13 : f32 to vector<3x1xf32>
    %40 = arith.mulf %38, %39 : vector<3x1xf32>
    %cst_14 = arith.constant 1.000000e+00 : f32
    %41 = vector.broadcast %cst_14 : f32 to vector<3x1xf32>
    %42 = arith.cmpf ogt, %38, %41 : vector<3x1xf32>
    %43 = arith.extui %42 : vector<3x1xi1> to vector<3x1xi32>
    %44 = arith.sitofp %43 : vector<3x1xi32> to vector<3x1xf32>
    %45 = arith.mulf %40, %44 : vector<3x1xf32>
    %cst_15 = arith.constant 1.000000e+00 : f32
    %46 = vector.broadcast %cst_15 : f32 to vector<8x8xf32>
    %47 = vector.extract_strided_slice %32 {offsets = [0, 0], sizes = [8, 1], strides = [1, 1]} : vector<8x3xf32> to vector<8x1xf32>
    %48 = vector.extract_strided_slice %31 {offsets = [0, 0], sizes = [1, 8], strides = [1, 1]} : vector<3x8xf32> to vector<1x8xf32>
    %cst_16 = arith.constant -1.000000e+00 : f32
    %49 = vector.broadcast %cst_16 : f32 to vector<8x1xf32>
    %50 = arith.cmpf one, %47, %49 : vector<8x1xf32>
    %51 = arith.extui %50 : vector<8x1xi1> to vector<8x1xi32>
    %52 = arith.sitofp %51 : vector<8x1xi32> to vector<8x1xf32>
    %53 = vector.extract_strided_slice %36 {offsets = [0, 0], sizes = [1, 8], strides = [1, 1]} : vector<3x8xf32> to vector<1x8xf32>
    %54 = vector.broadcast %52 : vector<8x1xf32> to vector<8x8xf32>
    %55 = vector.broadcast %53 : vector<1x8xf32> to vector<8x8xf32>
    %56 = arith.mulf %54, %55 : vector<8x8xf32>
    %57 = vector.broadcast %47 : vector<8x1xf32> to vector<8x8xf32>
    %58 = vector.broadcast %48 : vector<1x8xf32> to vector<8x8xf32>
    %59 = arith.cmpf oeq, %57, %58 : vector<8x8xf32>
    %60 = arith.extui %59 : vector<8x8xi1> to vector<8x8xi32>
    %61 = arith.sitofp %60 : vector<8x8xi32> to vector<8x8xf32>
    %62 = arith.mulf %61, %56 : vector<8x8xf32>
    %63 = vector.extract_strided_slice %45 {offsets = [0, 0], sizes = [1, 1], strides = [1, 1]} : vector<3x1xf32> to vector<1x1xf32>
    %64 = vector.broadcast %63 : vector<1x1xf32> to vector<8x8xf32>
    %65 = arith.mulf %62, %64 : vector<8x8xf32>
    %66 = arith.addf %46, %65 : vector<8x8xf32>
    %67 = vector.extract_strided_slice %32 {offsets = [0, 1], sizes = [8, 1], strides = [1, 1]} : vector<8x3xf32> to vector<8x1xf32>
    %68 = vector.extract_strided_slice %31 {offsets = [1, 0], sizes = [1, 8], strides = [1, 1]} : vector<3x8xf32> to vector<1x8xf32>
    %cst_17 = arith.constant -1.000000e+00 : f32
    %69 = vector.broadcast %cst_17 : f32 to vector<8x1xf32>
    %70 = arith.cmpf one, %67, %69 : vector<8x1xf32>
    %71 = arith.extui %70 : vector<8x1xi1> to vector<8x1xi32>
    %72 = arith.sitofp %71 : vector<8x1xi32> to vector<8x1xf32>
    %73 = vector.extract_strided_slice %36 {offsets = [1, 0], sizes = [1, 8], strides = [1, 1]} : vector<3x8xf32> to vector<1x8xf32>
    %74 = vector.broadcast %72 : vector<8x1xf32> to vector<8x8xf32>
    %75 = vector.broadcast %73 : vector<1x8xf32> to vector<8x8xf32>
    %76 = arith.mulf %74, %75 : vector<8x8xf32>
    %77 = vector.broadcast %67 : vector<8x1xf32> to vector<8x8xf32>
    %78 = vector.broadcast %68 : vector<1x8xf32> to vector<8x8xf32>
    %79 = arith.cmpf oeq, %77, %78 : vector<8x8xf32>
    %80 = arith.extui %79 : vector<8x8xi1> to vector<8x8xi32>
    %81 = arith.sitofp %80 : vector<8x8xi32> to vector<8x8xf32>
    %82 = arith.mulf %81, %76 : vector<8x8xf32>
    %83 = vector.extract_strided_slice %45 {offsets = [1, 0], sizes = [1, 1], strides = [1, 1]} : vector<3x1xf32> to vector<1x1xf32>
    %84 = vector.broadcast %83 : vector<1x1xf32> to vector<8x8xf32>
    %85 = arith.mulf %82, %84 : vector<8x8xf32>
    %86 = arith.addf %66, %85 : vector<8x8xf32>
    %87 = vector.extract_strided_slice %32 {offsets = [0, 2], sizes = [8, 1], strides = [1, 1]} : vector<8x3xf32> to vector<8x1xf32>
    %88 = vector.extract_strided_slice %31 {offsets = [2, 0], sizes = [1, 8], strides = [1, 1]} : vector<3x8xf32> to vector<1x8xf32>
    %cst_18 = arith.constant -1.000000e+00 : f32
    %89 = vector.broadcast %cst_18 : f32 to vector<8x1xf32>
    %90 = arith.cmpf one, %87, %89 : vector<8x1xf32>
    %91 = arith.extui %90 : vector<8x1xi1> to vector<8x1xi32>
    %92 = arith.sitofp %91 : vector<8x1xi32> to vector<8x1xf32>
    %93 = vector.extract_strided_slice %36 {offsets = [2, 0], sizes = [1, 8], strides = [1, 1]} : vector<3x8xf32> to vector<1x8xf32>
    %94 = vector.broadcast %92 : vector<8x1xf32> to vector<8x8xf32>
    %95 = vector.broadcast %93 : vector<1x8xf32> to vector<8x8xf32>
    %96 = arith.mulf %94, %95 : vector<8x8xf32>
    %97 = vector.broadcast %87 : vector<8x1xf32> to vector<8x8xf32>
    %98 = vector.broadcast %88 : vector<1x8xf32> to vector<8x8xf32>
    %99 = arith.cmpf oeq, %97, %98 : vector<8x8xf32>
    %100 = arith.extui %99 : vector<8x8xi1> to vector<8x8xi32>
    %101 = arith.sitofp %100 : vector<8x8xi32> to vector<8x8xf32>
    %102 = arith.mulf %101, %96 : vector<8x8xf32>
    %103 = vector.extract_strided_slice %45 {offsets = [2, 0], sizes = [1, 1], strides = [1, 1]} : vector<3x1xf32> to vector<1x1xf32>
    %104 = vector.broadcast %103 : vector<1x1xf32> to vector<8x8xf32>
    %105 = arith.mulf %102, %104 : vector<8x8xf32>
    %106 = arith.addf %86, %105 : vector<8x8xf32>
    %cst_19 = arith.constant 0.333333343 : f32
    %107 = vector.broadcast %cst_19 : f32 to vector<8x8xf32>
    %108 = arith.mulf %106, %107 : vector<8x8xf32>
    %cst_20 = arith.constant 1.000000e+00 : f32
    %109 = vector.broadcast %cst_20 : f32 to vector<8x8xf32>
    %110 = arith.cmpf ogt, %108, %109 : vector<8x8xf32>
    %cst_21 = arith.constant 5.000000e+00 : f32
    %111 = vector.broadcast %cst_21 : f32 to vector<8x8xf32>
    %112 = arith.mulf %108, %111 : vector<8x8xf32>
    %cst_22 = arith.constant 1.000000e+00 : f32
    %113 = vector.broadcast %cst_22 : f32 to vector<8x8xf32>
    %114 = arith.cmpf olt, %108, %113 : vector<8x8xf32>
    %cst_23 = arith.constant 2.000000e-01 : f32
    %115 = vector.broadcast %cst_23 : f32 to vector<8x8xf32>
    %116 = arith.mulf %108, %115 : vector<8x8xf32>
    %117 = arith.select %114, %116, %108 : vector<8x8xi1>, vector<8x8xf32>
    %118 = arith.select %110, %112, %117 : vector<8x8xi1>, vector<8x8xf32>
    %c0_24 = arith.constant 0 : index
    %c0_25 = arith.constant 0 : index
    %119 = vector.load %arg9[%c0_24, %c0_25] : memref<2x8xf32, #tpu.memory_space<vmem>>, vector<2x8xf32>
    %c0_26 = arith.constant 0 : index
    %c0_27 = arith.constant 0 : index
    %120 = vector.load %arg8[%c0_26, %c0_27] : memref<8x2xf32, #tpu.memory_space<vmem>>, vector<8x2xf32>
    %cst_28 = arith.constant -1.000000e+00 : f32
    %121 = vector.broadcast %cst_28 : f32 to vector<2x8xf32>
    %122 = arith.cmpf one, %119, %121 : vector<2x8xf32>
    %123 = arith.extui %122 : vector<2x8xi1> to vector<2x8xi32>
    %124 = arith.sitofp %123 : vector<2x8xi32> to vector<2x8xf32>
    %cst_29 = arith.constant dense<0.000000e+00> : vector<2xf32>
    %125 = vector.multi_reduction <add>, %124, %cst_29 [1] : vector<2x8xf32> to vector<2xf32>
    %126 = vector.shape_cast %125 : vector<2xf32> to vector<2x1xf32>
    %cst_30 = arith.constant 1.250000e-01 : f32
    %127 = vector.broadcast %cst_30 : f32 to vector<2x1xf32>
    %128 = arith.mulf %126, %127 : vector<2x1xf32>
    %cst_31 = arith.constant 1.000000e+00 : f32
    %129 = vector.broadcast %cst_31 : f32 to vector<2x1xf32>
    %130 = arith.cmpf ogt, %126, %129 : vector<2x1xf32>
    %131 = arith.extui %130 : vector<2x1xi1> to vector<2x1xi32>
    %132 = arith.sitofp %131 : vector<2x1xi32> to vector<2x1xf32>
    %133 = arith.mulf %128, %132 : vector<2x1xf32>
    %134 = arith.mulf %119, %124 : vector<2x8xf32>
    %cst_32 = arith.constant dense<0.000000e+00> : vector<2xf32>
    %135 = vector.multi_reduction <add>, %134, %cst_32 [1] : vector<2x8xf32> to vector<2xf32>
    %136 = vector.shape_cast %135 : vector<2xf32> to vector<2x1xf32>
    %cst_33 = arith.constant 1.000000e+00 : f32
    %137 = vector.broadcast %cst_33 : f32 to vector<2x1xf32>
    %138 = arith.maximumf %126, %137 : vector<2x1xf32>
    %139 = arith.divf %136, %138 : vector<2x1xf32>
    %140 = vector.broadcast %139 : vector<2x1xf32> to vector<2x8xf32>
    %141 = arith.subf %119, %140 : vector<2x8xf32>
    %142 = arith.mulf %141, %141 : vector<2x8xf32>
    %143 = arith.mulf %142, %124 : vector<2x8xf32>
    %cst_34 = arith.constant dense<0.000000e+00> : vector<2xf32>
    %144 = vector.multi_reduction <add>, %143, %cst_34 [1] : vector<2x8xf32> to vector<2xf32>
    %145 = vector.shape_cast %144 : vector<2xf32> to vector<2x1xf32>
    %cst_35 = arith.constant 1.000000e+00 : f32
    %146 = vector.broadcast %cst_35 : f32 to vector<2x1xf32>
    %147 = arith.subf %126, %146 : vector<2x1xf32>
    %cst_36 = arith.constant 1.000000e+00 : f32
    %148 = vector.broadcast %cst_36 : f32 to vector<2x1xf32>
    %149 = arith.maximumf %147, %148 : vector<2x1xf32>
    %150 = arith.divf %145, %149 : vector<2x1xf32>
    %151 = math.sqrt %150 : vector<2x1xf32>
    %cst_37 = arith.constant 9.99999997E-7 : f32
    %152 = vector.broadcast %cst_37 : f32 to vector<2x1xf32>
    %153 = arith.addf %151, %152 : vector<2x1xf32>
    %cst_38 = arith.constant 1.000000e+00 : f32
    %154 = vector.broadcast %cst_38 : f32 to vector<2x1xf32>
    %155 = arith.divf %154, %153 : vector<2x1xf32>
    %cst_39 = arith.constant 1.000000e+00 : f32
    %156 = vector.broadcast %cst_39 : f32 to vector<8x8xf32>
    %157 = vector.extract_strided_slice %120 {offsets = [0, 0], sizes = [8, 1], strides = [1, 1]} : vector<8x2xf32> to vector<8x1xf32>
    %158 = vector.extract_strided_slice %119 {offsets = [0, 0], sizes = [1, 8], strides = [1, 1]} : vector<2x8xf32> to vector<1x8xf32>
    %cst_40 = arith.constant -1.000000e+00 : f32
    %159 = vector.broadcast %cst_40 : f32 to vector<8x1xf32>
    %160 = arith.cmpf one, %157, %159 : vector<8x1xf32>
    %161 = arith.extui %160 : vector<8x1xi1> to vector<8x1xi32>
    %162 = arith.sitofp %161 : vector<8x1xi32> to vector<8x1xf32>
    %163 = vector.extract_strided_slice %124 {offsets = [0, 0], sizes = [1, 8], strides = [1, 1]} : vector<2x8xf32> to vector<1x8xf32>
    %164 = vector.broadcast %162 : vector<8x1xf32> to vector<8x8xf32>
    %165 = vector.broadcast %163 : vector<1x8xf32> to vector<8x8xf32>
    %166 = arith.mulf %164, %165 : vector<8x8xf32>
    %167 = arith.mulf %166, %30 : vector<8x8xf32>
    %168 = vector.extract_strided_slice %139 {offsets = [0, 0], sizes = [1, 1], strides = [1, 1]} : vector<2x1xf32> to vector<1x1xf32>
    %169 = vector.broadcast %168 : vector<1x1xf32> to vector<8x1xf32>
    %170 = arith.subf %157, %169 : vector<8x1xf32>
    %171 = vector.extract_strided_slice %155 {offsets = [0, 0], sizes = [1, 1], strides = [1, 1]} : vector<2x1xf32> to vector<1x1xf32>
    %172 = vector.broadcast %171 : vector<1x1xf32> to vector<8x1xf32>
    %173 = arith.mulf %170, %172 : vector<8x1xf32>
    %174 = vector.extract_strided_slice %139 {offsets = [0, 0], sizes = [1, 1], strides = [1, 1]} : vector<2x1xf32> to vector<1x1xf32>
    %175 = vector.broadcast %174 : vector<1x1xf32> to vector<1x8xf32>
    %176 = arith.subf %158, %175 : vector<1x8xf32>
    %177 = vector.extract_strided_slice %155 {offsets = [0, 0], sizes = [1, 1], strides = [1, 1]} : vector<2x1xf32> to vector<1x1xf32>
    %178 = vector.broadcast %177 : vector<1x1xf32> to vector<1x8xf32>
    %179 = arith.mulf %176, %178 : vector<1x8xf32>
    %180 = vector.broadcast %173 : vector<8x1xf32> to vector<8x8xf32>
    %181 = vector.broadcast %179 : vector<1x8xf32> to vector<8x8xf32>
    %182 = arith.subf %180, %181 : vector<8x8xf32>
    %183 = arith.mulf %182, %182 : vector<8x8xf32>
    %184 = arith.mulf %183, %167 : vector<8x8xf32>
    %cst_41 = arith.constant -5.000000e-01 : f32
    %185 = vector.broadcast %cst_41 : f32 to vector<8x8xf32>
    %186 = arith.mulf %185, %184 : vector<8x8xf32>
    %187 = math.exp %186 : vector<8x8xf32>
    %188 = vector.extract_strided_slice %133 {offsets = [0, 0], sizes = [1, 1], strides = [1, 1]} : vector<2x1xf32> to vector<1x1xf32>
    %189 = vector.broadcast %188 : vector<1x1xf32> to vector<8x8xf32>
    %190 = arith.mulf %187, %189 : vector<8x8xf32>
    %191 = arith.addf %156, %190 : vector<8x8xf32>
    %192 = vector.extract_strided_slice %120 {offsets = [0, 1], sizes = [8, 1], strides = [1, 1]} : vector<8x2xf32> to vector<8x1xf32>
    %193 = vector.extract_strided_slice %119 {offsets = [1, 0], sizes = [1, 8], strides = [1, 1]} : vector<2x8xf32> to vector<1x8xf32>
    %cst_42 = arith.constant -1.000000e+00 : f32
    %194 = vector.broadcast %cst_42 : f32 to vector<8x1xf32>
    %195 = arith.cmpf one, %192, %194 : vector<8x1xf32>
    %196 = arith.extui %195 : vector<8x1xi1> to vector<8x1xi32>
    %197 = arith.sitofp %196 : vector<8x1xi32> to vector<8x1xf32>
    %198 = vector.extract_strided_slice %124 {offsets = [1, 0], sizes = [1, 8], strides = [1, 1]} : vector<2x8xf32> to vector<1x8xf32>
    %199 = vector.broadcast %197 : vector<8x1xf32> to vector<8x8xf32>
    %200 = vector.broadcast %198 : vector<1x8xf32> to vector<8x8xf32>
    %201 = arith.mulf %199, %200 : vector<8x8xf32>
    %202 = arith.mulf %201, %30 : vector<8x8xf32>
    %203 = vector.extract_strided_slice %139 {offsets = [1, 0], sizes = [1, 1], strides = [1, 1]} : vector<2x1xf32> to vector<1x1xf32>
    %204 = vector.broadcast %203 : vector<1x1xf32> to vector<8x1xf32>
    %205 = arith.subf %192, %204 : vector<8x1xf32>
    %206 = vector.extract_strided_slice %155 {offsets = [1, 0], sizes = [1, 1], strides = [1, 1]} : vector<2x1xf32> to vector<1x1xf32>
    %207 = vector.broadcast %206 : vector<1x1xf32> to vector<8x1xf32>
    %208 = arith.mulf %205, %207 : vector<8x1xf32>
    %209 = vector.extract_strided_slice %139 {offsets = [1, 0], sizes = [1, 1], strides = [1, 1]} : vector<2x1xf32> to vector<1x1xf32>
    %210 = vector.broadcast %209 : vector<1x1xf32> to vector<1x8xf32>
    %211 = arith.subf %193, %210 : vector<1x8xf32>
    %212 = vector.extract_strided_slice %155 {offsets = [1, 0], sizes = [1, 1], strides = [1, 1]} : vector<2x1xf32> to vector<1x1xf32>
    %213 = vector.broadcast %212 : vector<1x1xf32> to vector<1x8xf32>
    %214 = arith.mulf %211, %213 : vector<1x8xf32>
    %215 = vector.broadcast %208 : vector<8x1xf32> to vector<8x8xf32>
    %216 = vector.broadcast %214 : vector<1x8xf32> to vector<8x8xf32>
    %217 = arith.subf %215, %216 : vector<8x8xf32>
    %218 = arith.mulf %217, %217 : vector<8x8xf32>
    %219 = arith.mulf %218, %202 : vector<8x8xf32>
    %cst_43 = arith.constant -5.000000e-01 : f32
    %220 = vector.broadcast %cst_43 : f32 to vector<8x8xf32>
    %221 = arith.mulf %220, %219 : vector<8x8xf32>
    %222 = math.exp %221 : vector<8x8xf32>
    %223 = vector.extract_strided_slice %133 {offsets = [1, 0], sizes = [1, 1], strides = [1, 1]} : vector<2x1xf32> to vector<1x1xf32>
    %224 = vector.broadcast %223 : vector<1x1xf32> to vector<8x8xf32>
    %225 = arith.mulf %222, %224 : vector<8x8xf32>
    %226 = arith.addf %191, %225 : vector<8x8xf32>
    %cst_44 = arith.constant 5.000000e-01 : f32
    %227 = vector.broadcast %cst_44 : f32 to vector<8x8xf32>
    %228 = arith.mulf %226, %227 : vector<8x8xf32>
    %cst_45 = arith.constant 1.000000e+00 : f32
    %229 = vector.broadcast %cst_45 : f32 to vector<8x8xf32>
    %230 = arith.cmpf ogt, %228, %229 : vector<8x8xf32>
    %cst_46 = arith.constant 5.000000e+00 : f32
    %231 = vector.broadcast %cst_46 : f32 to vector<8x8xf32>
    %232 = arith.mulf %228, %231 : vector<8x8xf32>
    %cst_47 = arith.constant 1.000000e+00 : f32
    %233 = vector.broadcast %cst_47 : f32 to vector<8x8xf32>
    %234 = arith.cmpf olt, %228, %233 : vector<8x8xf32>
    %cst_48 = arith.constant 2.000000e-01 : f32
    %235 = vector.broadcast %cst_48 : f32 to vector<8x8xf32>
    %236 = arith.mulf %228, %235 : vector<8x8xf32>
    %237 = arith.select %234, %236, %228 : vector<8x8xi1>, vector<8x8xf32>
    %238 = arith.select %230, %232, %237 : vector<8x8xi1>, vector<8x8xf32>
    %239 = arith.mulf %118, %238 : vector<8x8xf32>
    %c0_49 = arith.constant 0 : index
    %c0_50 = arith.constant 0 : index
    %240 = vector.load %arg4[%c0_49, %c0_50] : memref<8x32xf32, #tpu.memory_space<vmem>>, vector<8x32xf32>
    %c0_51 = arith.constant 0 : index
    %c0_52 = arith.constant 0 : index
    %241 = vector.load %arg5[%c0_51, %c0_52] : memref<32x8xf32, #tpu.memory_space<vmem>>, vector<32x8xf32>
    %242 = arith.mulf %240, %240 : vector<8x32xf32>
    %cst_53 = arith.constant dense<0.000000e+00> : vector<8xf32>
    %243 = vector.multi_reduction <add>, %242, %cst_53 [1] : vector<8x32xf32> to vector<8xf32>
    %244 = vector.shape_cast %243 : vector<8xf32> to vector<8x1xf32>
    %245 = math.sqrt %244 : vector<8x1xf32>
    %cst_54 = arith.constant 9.99999996E-13 : f32
    %246 = vector.broadcast %cst_54 : f32 to vector<8x1xf32>
    %247 = arith.maximumf %245, %246 : vector<8x1xf32>
    %248 = vector.broadcast %247 : vector<8x1xf32> to vector<8x32xf32>
    %249 = arith.divf %240, %248 : vector<8x32xf32>
    %250 = arith.mulf %241, %241 : vector<32x8xf32>
    %cst_55 = arith.constant dense<0.000000e+00> : vector<8xf32>
    %251 = vector.multi_reduction <add>, %250, %cst_55 [0] : vector<32x8xf32> to vector<8xf32>
    %252 = vector.shape_cast %251 : vector<8xf32> to vector<1x8xf32>
    %253 = math.sqrt %252 : vector<1x8xf32>
    %cst_56 = arith.constant 9.99999996E-13 : f32
    %254 = vector.broadcast %cst_56 : f32 to vector<1x8xf32>
    %255 = arith.maximumf %253, %254 : vector<1x8xf32>
    %256 = vector.broadcast %255 : vector<1x8xf32> to vector<32x8xf32>
    %257 = arith.divf %241, %256 : vector<32x8xf32>
    %cst_57 = arith.constant dense<0.000000e+00> : vector<8x8xf32>
    %258 = tpu.matmul %249, %257, %cst_57 {dimension_numbers = #tpu.dot_dimension_numbers<[1], [0], [0], [1], [0, 0, 1, 1], [], []>} : vector<8x32xf32>, vector<32x8xf32>, vector<8x8xf32> -> vector<8x8xf32>
    %cst_58 = arith.constant 1.000000e+01 : f32
    %259 = vector.broadcast %cst_58 : f32 to vector<8x8xf32>
    %260 = arith.mulf %258, %259 : vector<8x8xf32>
    %cst_59 = arith.constant dense<0xFF800000> : vector<8xf32>
    %261 = vector.multi_reduction <maximumf>, %260, %cst_59 [1] : vector<8x8xf32> to vector<8xf32>
    %262 = vector.shape_cast %261 : vector<8xf32> to vector<8x1xf32>
    %263 = vector.broadcast %262 : vector<8x1xf32> to vector<8x8xf32>
    %264 = arith.subf %260, %263 : vector<8x8xf32>
    %265 = arith.mulf %264, %239 : vector<8x8xf32>
    %c0_60 = arith.constant 0 : index
    %c0_61 = arith.constant 0 : index
    %266 = vector.load %arg3[%c0_60, %c0_61] : memref<1x8xi32, #tpu.memory_space<vmem>>, vector<1x8xi32>
    %267 = vector.broadcast %2 : vector<8x1xi32> to vector<8x8xi32>
    %268 = vector.broadcast %266 : vector<1x8xi32> to vector<8x8xi32>
    %269 = arith.cmpi eq, %267, %268 : vector<8x8xi32>
    %270 = arith.extui %269 : vector<8x8xi1> to vector<8x8xi32>
    %271 = arith.sitofp %270 : vector<8x8xi32> to vector<8x8xf32>
    %272 = arith.mulf %271, %30 : vector<8x8xf32>
    %273 = math.exp %265 : vector<8x8xf32>
    %274 = arith.mulf %273, %30 : vector<8x8xf32>
    %cst_62 = arith.constant dense<0.000000e+00> : vector<8xf32>
    %275 = vector.multi_reduction <add>, %274, %cst_62 [1] : vector<8x8xf32> to vector<8xf32>
    %276 = vector.shape_cast %275 : vector<8xf32> to vector<8x1xf32>
    %277 = math.log %276 : vector<8x1xf32>
    %278 = vector.broadcast %277 : vector<8x1xf32> to vector<8x8xf32>
    %279 = arith.subf %265, %278 : vector<8x8xf32>
    %cst_63 = arith.constant dense<0.000000e+00> : vector<8xf32>
    %280 = vector.multi_reduction <add>, %272, %cst_63 [1] : vector<8x8xf32> to vector<8xf32>
    %281 = vector.shape_cast %280 : vector<8xf32> to vector<8x1xf32>
    %cst_64 = arith.constant 9.99999997E-7 : f32
    %282 = vector.broadcast %cst_64 : f32 to vector<8x1xf32>
    %283 = arith.cmpf olt, %281, %282 : vector<8x1xf32>
    %cst_65 = arith.constant 1.000000e+00 : f32
    %284 = vector.broadcast %cst_65 : f32 to vector<8x1xf32>
    %285 = arith.select %283, %284, %281 : vector<8x1xi1>, vector<8x1xf32>
    %286 = arith.mulf %272, %279 : vector<8x8xf32>
    %cst_66 = arith.constant dense<0.000000e+00> : vector<8xf32>
    %287 = vector.multi_reduction <add>, %286, %cst_66 [1] : vector<8x8xf32> to vector<8xf32>
    %288 = vector.shape_cast %287 : vector<8xf32> to vector<8x1xf32>
    %289 = arith.divf %288, %285 : vector<8x1xf32>
    %cst_67 = arith.constant -1.42857146 : f32
    %290 = vector.broadcast %cst_67 : f32 to vector<8x1xf32>
    %291 = arith.mulf %290, %289 : vector<8x1xf32>
    %292 = vector.shape_cast %291 : vector<8x1xf32> to vector<1x8x1xf32>
    %cst_68 = arith.constant dense<0.000000e+00> : vector<1xf32>
    %293 = vector.multi_reduction <add>, %292, %cst_68 [1, 2] : vector<1x8x1xf32> to vector<1xf32>
    %294 = vector.shape_cast %293 : vector<1xf32> to vector<1x1x1xf32>
    %295 = vector.extract %294[0, 0, 0] : f32 from vector<1x1x1xf32>
    %296 = tpu.iota {dimensions = array<i32: 1>} : vector<1x128xi32>
    %c0_i32 = arith.constant 0 : i32
    %297 = vector.broadcast %c0_i32 : i32 to vector<1x128xi32>
    %298 = arith.cmpi eq, %296, %297 : vector<1x128xi32>
    %c1_i32 = arith.constant 1 : i32
    %299 = vector.broadcast %c1_i32 : i32 to vector<1x128xi32>
    %300 = arith.cmpi eq, %296, %299 : vector<1x128xi32>
    %cst_69 = arith.constant 0.000000e+00 : f32
    %301 = vector.broadcast %295 : f32 to vector<1x128xf32>
    %302 = vector.broadcast %cst_69 : f32 to vector<1x128xf32>
    %303 = arith.select %300, %301, %302 : vector<1x128xi1>, vector<1x128xf32>
    %304 = vector.broadcast %23 : f32 to vector<1x128xf32>
    %305 = arith.select %298, %304, %303 : vector<1x128xi1>, vector<1x128xf32>
    %c0_70 = arith.constant 0 : index
    %c0_71 = arith.constant 0 : index
    %306 = vector.load %arg10[%c0_70, %c0_71] : memref<1x128xf32, #tpu.memory_space<vmem>>, vector<1x128xf32>
    tpu.vector_store %arg10[%c0_70, %c0_71], %305 {strides = array<i32>} : memref<1x128xf32, #tpu.memory_space<vmem>>, vector<1x128xf32>,
    return
  }
  func.func @transform_0(%arg0: i32) -> (i32, i32) {
    %c0_i32 = arith.constant 0 : i32
    %c0_i32_0 = arith.constant 0 : i32
    return %arg0, %c0_i32 : i32, i32
  }
  func.func @transform_1(%arg0: i32) -> (i32, i32) {
    %c0_i32 = arith.constant 0 : i32
    %c0_i32_0 = arith.constant 0 : i32
    return %arg0, %c0_i32 : i32, i32
  }
  func.func @transform_2(%arg0: i32) -> (i32, i32) {
    %c0_i32 = arith.constant 0 : i32
    %c0_i32_0 = arith.constant 0 : i32
    %c0_i32_1 = arith.constant 0 : i32
    return %c0_i32, %c0_i32_0 : i32, i32
  }
  func.func @transform_3(%arg0: i32) -> (i32, i32) {
    %c0_i32 = arith.constant 0 : i32
    %c0_i32_0 = arith.constant 0 : i32
    return %arg0, %c0_i32 : i32, i32
  }
  func.func @transform_4(%arg0: i32) -> (i32, i32) {
    %c0_i32 = arith.constant 0 : i32
    %c0_i32_0 = arith.constant 0 : i32
    %c0_i32_1 = arith.constant 0 : i32
    return %c0_i32, %c0_i32_0 : i32, i32
  }
  func.func @transform_5(%arg0: i32) -> (i32, i32) {
    %c0_i32 = arith.constant 0 : i32
    %c0_i32_0 = arith.constant 0 : i32
    return %arg0, %c0_i32 : i32, i32
  }
  func.func @transform_6(%arg0: i32) -> (i32, i32) {
    %c0_i32 = arith.constant 0 : i32
    %c0_i32_0 = arith.constant 0 : i32
    %c0_i32_1 = arith.constant 0 : i32
    return %c0_i32, %c0_i32_0 : i32, i32
  }
  func.func @transform_7(%arg0: i32) -> (i32, i32) {
    %c0_i32 = arith.constant 0 : i32
    %c0_i32_0 = arith.constant 0 : i32
    return %arg0, %c0_i32 : i32, i32
  }
  func.func @transform_8(%arg0: i32) -> (i32, i32) {
    %c0_i32 = arith.constant 0 : i32
    %c0_i32_0 = arith.constant 0 : i32
    %c0_i32_1 = arith.constant 0 : i32
    return %c0_i32, %c0_i32_0 : i32, i32
  }
  func.func @transform_9(%arg0: i32) -> (i32, i32) {
    %c0_i32 = arith.constant 0 : i32
    %c0_i32_0 = arith.constant 0 : i32
    return %arg0, %c0_i32 : i32, i32
  }
}

</mosaic_0001>

<bundles_post_ra>
// kernel: loss_function_forward.1
= control target key start
LH: loop header
LB: loop body
LE: loop exit
PB: predicated region body
PF: predicated region fallthrough
CT: control target
= control target key end

     0   :  { %vm313_vm0 = vcmask 261120   ;;  %v554_v3 = vmov 0.0   ;;  %vm162_vm2 = vcmask 58368   ;;  %vm349_vm3 = vcmask 64512   ;;  %s757_s3 = inlined_call_operand.vmem [shape: f32[8,32], index: 3, kind: input, shape index: {}]   ;;  %s758_s8 = inlined_call_operand.vmem [shape: f32[2,8], index: 8, kind: input, shape index: {}]   ;;  %s759_s4 = inlined_call_operand.vmem [shape: f32[32,8], index: 4, kind: input, shape index: {}]   ;;  %s760_s5 = inlined_call_operand.vmem [shape: f32[8,3], index: 5, kind: input, shape index: {}]   ;;  %s761_s7 = inlined_call_operand.vmem [shape: f32[8,2], index: 7, kind: input, shape index: {}]   ;;  %s762_s6 = inlined_call_operand.vmem [shape: f32[3,8], index: 6, kind: input, shape index: {}]   ;;  %s763_s0 = inlined_call_operand.vmem [shape: f32[8,2], index: 0, kind: input, shape index: {}]   ;;  %s764_s2 = inlined_call_operand.vmem [shape: s32[1,8], index: 2, kind: input, shape index: {}]   ;;  %s765_s1 = inlined_call_operand.vmem [shape: s32[8,1], index: 1, kind: input, shape index: {}]   ;;  %s766_s9 = inlined_call_operand.vmem [shape: f32[1,128], index: 9, kind: output, shape index: {}]  }
   0x1   :  { %v611_v0 = vld [vmem:[%s757_s3] sm:$0xff]  ;;  %v309_v10 = vld [vmem:[%s759_s4 + $0x8] sm:$0xff]  ;;  %v310_v13 = vld [vmem:[%s759_s4 + $0x10] sm:$0xff] }
   0x2   :  { %v616_v1 = vld [vmem:[%s758_s8] sm:$0x3]  ;;  %v312_v2 = vmul.f32 %v611_v0, %v611_v0  ;;  %v346_v12 = vmul.f32 %v309_v10, %v309_v10  ;;  %v347_v14 = vmul.f32 %v310_v13, %v310_v13  ;;  %v311_v17 = vld [vmem:[%s759_s4 + $0x18] sm:$0xff] }
   0x3   :  { %vm159_vm1 = vcmp.ne.f32.partialorder %v616_v1, -1.0  ;;  %v308_v9 = vld [vmem:[%s759_s4] sm:$0xff]  ;;  %v348_v19 = vmul.f32 %v311_v17, %v311_v17 }
   0x4   :  { %v622_v4 = vsel %vm159_vm1, 1.0, %v554_v3  ;;  %v314_v5 = vsel %vm313_vm0, %v312_v2, 0.0  ;;  %v345_v11 = vmul.f32 %v308_v9, %v308_v9  ;;  %v351_v16 = vsel %vm349_vm3, %v346_v12, 0.0 }
   0x5   :  { %v171_v6 = vmul.f32 %v622_v4, %v616_v1  ;;  %315 = vadd.xlane.f32.xlu0 %v314_v5  ;;  %v163_v8 = vsel %vm162_vm2, %v622_v4, 0.0  ;;  %v353_v20 = vsel %vm349_vm3, %v347_v14, 0.0  ;;  %v355_v22 = vsel %vm349_vm3, %v348_v19, 0.0 }
   0x6   :  { %v350_v15 = vsel %vm349_vm3, %v345_v11, 0.0 }
   0x7   :  { %v172_v7 = vsel %vm162_vm2, %v171_v6, 0.0  ;;  %v352_v18 = vadd.f32 %v351_v16, %v350_v15 }
   0x8   :  { %173 = vadd.xlane.f32.xlu1 %v172_v7 }
   0x9   :  { %v354_v21 = vadd.f32 %v353_v20, %v352_v18 }
   0xb   :  { %v356_v23 = vadd.f32 %v355_v22, %v354_v21 }
   0xd   :  { %164 = vadd.xlane.f32.xlu0 %v163_v8  ;;  %v357_v24 = vrot.slane %v356_v23, 4 }
   0xf   :  { %v358_v25 = vadd.f32 %v357_v24, %v356_v23 }
  0x11   :  { %v359_v26 = vrot.slane %v358_v25, 2 }
  0x13   :  { %v360_v27 = vadd.f32 %v359_v26, %v358_v25 }
  0x15   :  { %v361_v28 = vrot.slane %v360_v27, 1 }
  0x17   :  { %v362_v29 = vadd.f32 %v361_v28, %v360_v27 }
  0x19   :  { %524 = vrsqrt.f32 %v362_v29  ;;  %vm370_vm4 = vcmp.eq.f32.partialorder %v362_v29, inf  ;;  %v373_v37 = vand.u32 2147483648, %v362_v29  ;;  %vm372_vm5 = vcmp.eq.f32.partialorder %v362_v29, 0.0 }
  0x1f   :  { %v525_v30 = vpop.eup %524 }
  0x20   :  { %v364_v31 = vmul.f32 %v525_v30, %v362_v29 }
  0x22   :  { %v365_v32 = vmul.f32 %v525_v30, %v364_v31 }
  0x24   :  { %v366_v33 = vmul.f32 0.5, %v365_v32 }
  0x26   :  { %v367_v34 = vsub.f32 1.5, %v366_v33 }
  0x28   :  { %v368_v35 = vmul.f32 %v525_v30, %v367_v34 }
  0x2a   :  { %v369_v36 = vmul.f32 %v368_v35, %v362_v29 }
  0x2c   :  { %v371_v38 = vsel %vm370_vm4, %v362_v29, %v369_v36 }
  0x2d   :  { %v374_v39 = vsel %vm372_vm5, %v373_v37, %v371_v38 }
  0x2e   :  { %v375_v40 = vmax.f32 %v374_v39, 1e-12 }
  0x30   :  { %526 = vrcp.f32 %v375_v40  ;;  %vm381_vm6 = vweird.f32 %v375_v40  ;;  %v385_v45 = vand.u32 2147483647, %v375_v40  ;;  %v387_v46 = vand.u32 2147483648, %v375_v40 }
  0x32   :  { %vm386_vm9 = vcmp.eq.f32.partialorder %v385_v45, 8.507059e+37  ;;  %v388_v49 = vor.u32 1.1754944e-38, %v387_v46  ;;  %v556_v45 = vmov 1  }
  0x33   :  { %511 = vset.pattern.permute.xlu0 %v556_v45 }
  0x36   :  { %v527_v41 = vpop.eup %526 }
  0x37   :  { %v377_v42 = vmul.f32 %v527_v41, %v375_v40  ;;  %vm382_vm7 = vweird.f32 %v527_v41  ;;  %v555_v40 = vmov 0  }
  0x38   :  { %vm383_vm8 = vmor %vm381_vm6, %vm382_vm7  ;;  %517 = vset.pattern.permute.xlu1 %v555_v40  ;;  %505 = vset.pattern.permute.xlu2 %v555_v40 }
  0x39   :  { %v378_v43 = vsub.f32 1.0, %v377_v42  ;;  %v158_v42 = vld [vmem:[%s761_s7] sm:$0xff] }
  0x3b   :  { %v379_v44 = vmul.f32 %v527_v41, %v378_v43 }
  0x3d   :  { %v380_v47 = vadd.f32 %v527_v41, %v379_v44 }
  0x3f   :  { %v384_v50 = vsel %vm383_vm8, %v527_v41, %v380_v47  ;;  %v666_v41 = vld [vmem:[%s760_s5] sm:$0xff] }
  0x40   :  { %v389_v51 = vsel %vm386_vm9, %v388_v49, %v384_v50 }
  0x41   :  { %v393_v52 = vmul.f32 %v389_v51, %v311_v17  ;;  %v392_v53 = vmul.f32 %v389_v51, %v310_v13  ;;  %v391_v54 = vmul.f32 %v389_v51, %v309_v10  ;;  %v390_v58 = vmul.f32 %v389_v51, %v308_v9 }
  0x43   :  { %409 = vmatpush.msra.mxu0 %v393_v52 }
  0x45   :  { %410 = vmatpush.msra.mxu0 %v392_v53 }
  0x47   :  { %411 = vmatpush.msra.mxu0 %v391_v54 }
  0x49   :  { %412 = vmatpush.msra.mxu0 %v390_v58 }
  0x78   :  { %v316_v48 = vpop.xlane.xlu0 %315 }
  0x79   :  { %528 = vrsqrt.f32 %v316_v48  ;;  %vm324_vm10 = vcmp.eq.f32.partialorder %v316_v48, inf  ;;  %v327_v7 = vand.u32 2147483648, %v316_v48  ;;  %vm326_vm11 = vcmp.eq.f32.partialorder %v316_v48, 0.0 }
  0x7b   :  { %v174_v16 = vpop.xlane.xlu1 %173 }
  0x7f   :  { %v529_v55 = vpop.eup %528 }
  0x80   :  { %v318_v56 = vmul.f32 %v529_v55, %v316_v48  ;;  %v646_v57 = vpop.xlane.xlu0 %164 }
  0x81   :  { %v175_v59 = vmax.f32 %v646_v57, 1.0  ;;  %v493_v35 = vadd.f32 -1.0, %v646_v57 }
  0x82   :  { %v319_v60 = vmul.f32 %v529_v55, %v318_v56 }
  0x83   :  { %530 = vrcp.f32 %v175_v59  ;;  %v187_v12 = vand.u32 2147483648, %v175_v59  ;;  %v185_v14 = vand.u32 2147483647, %v175_v59  ;;  %vm181_vm13 = vweird.f32 %v175_v59 }
  0x84   :  { %v320_v61 = vmul.f32 0.5, %v319_v60  ;;  %v198_v36 = vmax.f32 %v493_v35, 1.0 }
  0x85   :  { %v188_v17 = vor.u32 1.1754944e-38, %v187_v12  ;;  %vm186_vm15 = vcmp.eq.f32.partialorder %v185_v14, 8.507059e+37 }
  0x86   :  { %v321_v62 = vsub.f32 1.5, %v320_v61  ;;  %vm204_vm8 = vweird.f32 %v198_v36  ;;  %v208_v49 = vand.u32 2147483647, %v198_v36 }
  0x88   :  { %v322_v63 = vmul.f32 %v529_v55, %v321_v62 }
  0x89   :  { %v531_v2 = vpop.eup %530 }
  0x8a   :  { %v323_v5 = vmul.f32 %v322_v63, %v316_v48  ;;  %v177_v6 = vmul.f32 %v531_v2, %v175_v59  ;;  %vm182_vm12 = vweird.f32 %v531_v2 }
  0x8b   :  { %vm183_vm14 = vmor %vm181_vm13, %vm182_vm12 }
  0x8c   :  { %v325_v8 = vsel %vm324_vm10, %v316_v48, %v323_v5  ;;  %v178_v10 = vsub.f32 1.0, %v177_v6  ;;  %v210_v48 = vand.u32 2147483648, %v198_v36  ;;  %vm209_vm10 = vcmp.eq.f32.partialorder %v208_v49, 8.507059e+37 }
  0x8d   :  { %v328_v11 = vsel %vm326_vm11, %v327_v7, %v325_v8 }
  0x8e   :  { %v329_v9 = vmax.f32 %v328_v11, 1e-12  ;;  %v179_v13 = vmul.f32 %v531_v2, %v178_v10  ;;  %v211_v51 = vor.u32 1.1754944e-38, %v210_v48 }
  0x90   :  { %532 = vrcp.f32 %v329_v9  ;;  %v180_v15 = vadd.f32 %v531_v2, %v179_v13  ;;  %v341_v27 = vand.u32 2147483648, %v329_v9  ;;  %v339_v29 = vand.u32 2147483647, %v329_v9 }
  0x91   :  { %vm335_vm4 = vweird.f32 %v329_v9  ;;  %534 = vrcp.f32 %v198_v36 }
  0x92   :  { %v184_v18 = vsel %vm183_vm14, %v531_v2, %v180_v15  ;;  %v342_v32 = vor.u32 1.1754944e-38, %v341_v27  ;;  %vm340_vm6 = vcmp.eq.f32.partialorder %v339_v29, 8.507059e+37  ;;  %v557_v27 = vmov 2  }
  0x93   :  { %v189_v19 = vsel %vm186_vm15, %v188_v17, %v184_v18 }
  0x94   :  { %v649_v20 = vmul.f32 %v189_v19, %v174_v16 }
  0x96   :  { %v533_v21 = vpop.eup %532  ;;  %v653_v22 = vsub.f32 %v616_v1, %v649_v20  ;;  %v253_v13 = vperm.slane %v649_v20, 0  ;;  %v280_v14 = vperm.slane %v649_v20, 1  ;;  %v684_v20 = vld [vmem:[%s762_s6] sm:$0x7] }
  0x97   :  { %v331_v23 = vmul.f32 %v533_v21, %v329_v9  ;;  %vm336_vm1 = vweird.f32 %v533_v21  ;;  %v535_v37 = vpop.eup %534 }
  0x98   :  { %v192_v24 = vmul.f32 %v653_v22, %v653_v22  ;;  %vm337_vm5 = vmor %vm335_vm4, %vm336_vm1  ;;  %v200_v38 = vmul.f32 %v535_v37, %v198_v36  ;;  %vm205_vm7 = vweird.f32 %v535_v37  ;;  %v281_v19 = vsub.f32 %v158_v42, %v280_v14 }
  0x99   :  { %v332_v25 = vsub.f32 1.0, %v331_v23  ;;  %vm206_vm9 = vmor %vm204_vm8, %vm205_vm7  ;;  %v254_v23 = vsub.f32 %v158_v42, %v253_v13  ;;  %vm79_vm4 = vcmp.ne.f32.partialorder %v684_v20, -1.0  ;;  %v35_v36 = vlaneseq }
  0x9a   :  { %v193_v26 = vmul.f32 %v622_v4, %v192_v24  ;;  %v201_v39 = vsub.f32 1.0, %v200_v38 }
  0x9b   :  { %v333_v28 = vmul.f32 %v533_v21, %v332_v25 }
  0x9c   :  { %v194_v30 = vsel %vm162_vm2, %v193_v26, 0.0  ;;  %vm242_vm2 = vcmp.ne.f32.partialorder %v158_v42, -1.0  ;;  %v250_v42 = vperm.slane %v622_v4, 0 }
  0x9d   :  { %195 = vadd.xlane.f32.xlu1 %v194_v30  ;;  %v334_v31 = vadd.f32 %v533_v21, %v333_v28  ;;  %v494_v44 = vsel %vm242_vm2, 1.0, %v554_v3  ;;  %v688_v28 = vsel %vm79_vm4, 1.0, %v554_v3  ;;  %vm167_vm2 = vcmp.gt.f32.partialorder %v646_v57, 1.0 }
  0x9f   :  { %v338_v1 = vsel %vm337_vm5, %v533_v21, %v334_v31  ;;  %vm82_vm5 = vcmask 59392  }
  0xa0   :  { %v343_v33 = vsel %vm340_vm6, %v342_v32, %v338_v1  ;;  %v83_v29 = vsel %vm82_vm5, %v688_v28, 0.0  ;;  %v698_v1 = vld [vmem:[%s763_s0] sm:$0xff]  ;;  %vm37_vm6 = vcmask 15360  }
  0xa1   :  { %v344_v34 = vmul.f32 %v343_v33, %v611_v0  ;;  %v202_v0 = vmul.f32 %v535_v37, %v201_v39  ;;  %v38_v33 = vsel %vm37_vm6, %v698_v1, -inf  ;;  %v705_v39 = vand.u32 127, %v35_v36 }
  0xa3   :  { %495 = vmatmul.msk.f32.vlgmr.msra.gmra.mxu0 %vm313_vm0, %v344_v34  ;;  %vm91_vm0 = vcmp.ne.f32.partialorder %v666_v41, -1.0  ;;  %v203_v47 = vadd.f32 %v535_v37, %v202_v0 }
  0xa4   :  { %v487_v43 = vsel %vm91_vm0, 1.0, %v554_v3 }
  0xa5   :  { %v512_v46 = vpack.i.bf16 %v487_v43, %v494_v44  ;;  %v207_v50 = vsel %vm206_vm9, %v535_v37, %v203_v47  ;;  %v277_v44 = vperm.slane %v622_v4, 1 }
  0xa6   :  { %v212_v52 = vsel %vm209_vm10, %v211_v51, %v207_v50 }
  0xa7   :  { %507 = vperm.xlu2 %505, %v512_v46   ;;  %513 = vperm.xlu0 %511, %v512_v46  }
  0xaf   :  { %519 = vset.pattern.permute.xlu0 %v557_v27 }
  0xb0   :  { %133 = vperm.xlu0 %519, %v487_v43  }
  0xb6   :  { %103 = vperm.xlu1 %517, %v666_v41  }
  0xb8   :  { %522 = vset.pattern.permute.xlu0 %v556_v45 }
  0xbe   :  { %518 = vset.pattern.permute.xlu1 %v556_v45 }
 0x101   :  { %v508_v34 = vpop.permute.xlu2 %507 }
 0x102   :  { %v509_v43 = vunpack.i.l.bf16 %v508_v34 }
 0x110   :  { %v196_v53 = vpop.xlane.xlu1 %195 }
 0x111   :  { %v213_v54 = vmul.f32 %v212_v52, %v196_v53 }
 0x113   :  { %536 = vrsqrt.f32 %v213_v54  ;;  %vm221_vm11 = vcmp.eq.f32.partialorder %v213_v54, inf  ;;  %v224_v63 = vand.u32 2147483648, %v213_v54  ;;  %vm223_vm12 = vcmp.eq.f32.partialorder %v213_v54, 0.0 }
 0x119   :  { %v537_v55 = vpop.eup %536  ;;  %v703_v38 = vpop.permute.xlu0 %513 }
 0x11a   :  { %v215_v56 = vmul.f32 %v537_v55, %v213_v54  ;;  %v515_v45 = vunpack.i.l.bf16 %v703_v38 }
 0x11c   :  { %v216_v58 = vmul.f32 %v537_v55, %v215_v56  ;;  %v278_v49 = vmul.f32 %v515_v45, %v277_v44 }
 0x11e   :  { %v217_v59 = vmul.f32 0.5, %v216_v58 }
 0x120   :  { %v218_v60 = vsub.f32 1.5, %v217_v59  ;;  %v414_v30 = vpop.f32.mrf.mxu0 }
 0x121   :  { %v691_v31 = vmul.f32 10.0, %v414_v30 }
 0x122   :  { %v219_v61 = vmul.f32 %v537_v55, %v218_v60 }
 0x123   :  { %v418_v32 = vsel %vm349_vm3, %v691_v31, -inf }
 0x124   :  { %v220_v62 = vmul.f32 %v219_v61, %v213_v54 }
 0x126   :  { %v222_v2 = vsel %vm221_vm11, %v213_v54, %v220_v62  ;;  %v166_v62 = vmul.f32 0.125, %v646_v57 }
 0x127   :  { %v225_v5 = vsel %vm223_vm12, %v224_v63, %v222_v2  ;;  %v492_v63 = vsel %vm167_vm2, 1.0, %v554_v3  ;;  %vm59_vm2 = vcmask 7168  }
 0x128   :  { %v226_v6 = vadd.f32 1e-06, %v225_v5  ;;  %v104_v35 = vpop.permute.xlu1 %103  ;;  %v170_v5 = vmul.f32 %v492_v63, %v166_v62 }
 0x12a   :  { %538 = vrcp.f32 %v226_v6  ;;  %v238_v11 = vand.u32 2147483648, %v226_v6  ;;  %v236_v9 = vand.u32 2147483647, %v226_v6  ;;  %vm232_vm14 = vweird.f32 %v226_v6 }
 0x12b   :  { %v270_v57 = vperm.slane %v170_v5, 0  ;;  %v296_v14 = vperm.slane %v170_v5, 1 }
 0x12c   :  { %v239_v16 = vor.u32 1.1754944e-38, %v238_v11  ;;  %vm237_vm1 = vcmp.eq.f32.partialorder %v236_v9, 8.507059e+37  ;;  %v510_v11 = vunpack.i.h.bf16 %v508_v34  ;;  %v142_v9 = vperm.slane %v684_v20, 2 }
 0x130   :  { %v539_v7 = vpop.eup %538 }
 0x131   :  { %v228_v8 = vmul.f32 %v539_v7, %v226_v6  ;;  %vm233_vm13 = vweird.f32 %v539_v7  ;;  %v106_v6 = vperm.slane %v684_v20, 0 }
 0x132   :  { %vm234_vm15 = vmor %vm232_vm14, %vm233_vm13 }
 0x133   :  { %v229_v10 = vsub.f32 1.0, %v228_v8  ;;  %vm107_vm7 = vcmp.eq.f32.partialorder %v104_v35, %v106_v6 }
 0x135   :  { %v230_v12 = vmul.f32 %v539_v7, %v229_v10  ;;  %v99_v10 = vperm.slane %v688_v28, 0 }
 0x137   :  { %v231_v15 = vadd.f32 %v539_v7, %v230_v12  ;;  %v124_v12 = vperm.slane %v684_v20, 1 }
 0x139   :  { %v235_v17 = vsel %vm234_vm15, %v539_v7, %v231_v15  ;;  %v34_v7 = vld [vmem:[%s765_s1] sm:$0xff] }
 0x13a   :  { %v240_v18 = vsel %vm237_vm1, %v239_v16, %v235_v17  ;;  %v118_v17 = vperm.slane %v688_v28, 1 }
 0x13b   :  { %v282_v21 = vperm.slane %v240_v18, 1  ;;  %v255_v24 = vperm.slane %v240_v18, 0  ;;  %v257_v37 = vmul.f32 %v240_v18, %v653_v22  ;;  %v251_v22 = vmul.f32 %v509_v43, %v250_v42 }
 0x13c   :  { %v516_v18 = vunpack.i.h.bf16 %v703_v38 }
 0x13d   :  { %v283_v25 = vmul.f32 %v282_v21, %v281_v19  ;;  %v256_v26 = vmul.f32 %v255_v24, %v254_v23  ;;  %v289_v48 = vperm.slane %v257_v37, 1  ;;  %v136_v19 = vperm.slane %v688_v28, 2  ;;  %v134_v24 = vpop.permute.xlu0 %133 }
 0x13e   :  { %v100_v21 = vmul.f32 %v510_v11, %v99_v10  ;;  %v119_v30 = vmul.f32 %v516_v18, %v118_v17 }
 0x13f   :  { %286 = vperm.xlu1 %518, %v283_v25   ;;  %260 = vperm.xlu2 %505, %v256_v26  }
 0x147   :  { %121 = vperm.xlu1 %518, %v666_v41  }
 0x14f   :  { %520 = vset.pattern.permute.xlu1 %v557_v27  ;;  %v488_v27 = vsel %vm107_vm7, 1.0, %v554_v3  ;;  %vm474_vm7 = vcmp.eq.s32.totalorder %v705_v39, 1 }
 0x150   :  { %139 = vperm.xlu1 %520, %v666_v41   ;;  %v263_v41 = vperm.slane %v257_v37, 0  ;;  %v110_v35 = vmul.f32 %v488_v27, %v100_v21 }
 0x158   :  { %521 = vset.pattern.permute.xlu1 %v555_v40  ;;  %v71_v40 = vshrl.u32 %v35_v36, 7 }
 0x159   :  { %51 = vperm.xlu1 %521, %v34_v7  }
 0x15a   :  { %vm74_vm0 = vcmp.ne.s32.totalorder %v71_v40, %v705_v39 }
 0x15b   :  { %v712_v51 = vsel %vm74_vm0, 1.0, %v554_v3 }
 0x15c   :  { %v252_v53 = vmul.f32 %v712_v51, %v251_v22  ;;  %v279_v54 = vmul.f32 %v712_v51, %v278_v49 }
 0x168   :  { %84 = vadd.xlane.f32.xlu2 %v83_v29 }
 0x170   :  { %419 = vmax.xlane.f32.xlu2 %v418_v32 }
 0x178   :  { %39 = vmax.xlane.f32.xlu2 %v38_v33  ;;  %v137_v33 = vmul.f32 %v136_v19, %v134_v24 }
 0x199   :  { %v261_v0 = vpop.permute.xlu2 %260 }
 0x19a   :  { %v264_v47 = vsub.f32 %v261_v0, %v263_v41 }
 0x19c   :  { %v265_v52 = vmul.f32 %v264_v47, %v264_v47 }
 0x19e   :  { %v266_v4 = vmul.f32 %v265_v52, %v252_v53 }
 0x1a0   :  { %v267_v58 = vmul.f32 -0.5, %v266_v4 }
 0x1a2   :  { %v268_v60 = vmul.f32 1.442695, %v267_v58 }
 0x1a4   :  { %540 = vpow2.f32 %v268_v60 }
 0x1aa   :  { %v541_v8 = vpop.eup %540 }
 0x1ab   :  { %v271_v16 = vmul.f32 %v541_v8, %v270_v57 }
 0x1ad   :  { %v272_v29 = vadd.f32 1.0, %v271_v16 }
 0x1b1   :  { %v287_v46 = vpop.permute.xlu1 %286 }
 0x1b2   :  { %v290_v50 = vsub.f32 %v287_v46, %v289_v48 }
 0x1b4   :  { %v291_v55 = vmul.f32 %v290_v50, %v290_v50 }
 0x1b6   :  { %v292_v56 = vmul.f32 %v291_v55, %v279_v54 }
 0x1b8   :  { %v293_v59 = vmul.f32 -0.5, %v292_v56 }
 0x1b9   :  { %v122_v2 = vpop.permute.xlu1 %121 }
 0x1ba   :  { %v294_v61 = vmul.f32 1.442695, %v293_v59  ;;  %vm125_vm8 = vcmp.eq.f32.partialorder %v122_v2, %v124_v12  ;;  %v523_v12 = vld [vmem:[%s764_s2] ss:$0 sm:$0xff] }
 0x1bb   :  { %v489_v34 = vsel %vm125_vm8, 1.0, %v554_v3  ;;  %vm473_vm8 = vcmp.eq.s32.totalorder %v705_v39, 0 }
 0x1bc   :  { %542 = vpow2.f32 %v294_v61  ;;  %v128_v40 = vmul.f32 %v489_v34, %v119_v30 }
 0x1c2   :  { %v543_v13 = vpop.eup %542  ;;  %v140_v15 = vpop.permute.xlu1 %139 }
 0x1c3   :  { %v297_v25 = vmul.f32 %v543_v13, %v296_v14  ;;  %vm143_vm10 = vcmp.eq.f32.partialorder %v140_v15, %v142_v9 }
 0x1c4   :  { %v490_v28 = vsel %vm143_vm10, 1.0, %v554_v3 }
 0x1c5   :  { %v298_v36 = vadd.f32 %v297_v25, %v272_v29  ;;  %v146_v42 = vmul.f32 %v490_v28, %v137_v33 }
 0x1c7   :  { %v299_v44 = vmul.f32 0.5, %v298_v36 }
 0x1c9   :  { %v303_v49 = vmul.f32 0.2, %v299_v44  ;;  %vm302_vm11 = vcmp.lt.f32.partialorder %v299_v44, 1.0  ;;  %v301_v52 = vmul.f32 5.0, %v299_v44  ;;  %vm300_vm14 = vcmp.gt.f32.partialorder %v299_v44, 1.0 }
 0x1cb   :  { %v304_v4 = vsel %vm302_vm11, %v303_v49, %v299_v44  ;;  %v52_v57 = vpop.permute.xlu1 %51 }
 0x1cc   :  { %v305_v60 = vsel %vm300_vm14, %v301_v52, %v304_v4  ;;  %vm425_vm15 = vcmp.eq.s32.totalorder %v52_v57, %v523_v12  ;;  %vm53_vm1 = vcmp.eq.s32.totalorder %v705_v39, %v52_v57 }
 0x1cd   :  { %v54_v21 = vsel %vm53_vm1, %v698_v1, 0.0 }
 0x1db   :  { %v85_v23 = vpop.xlane.xlu2 %84 }
 0x1dc   :  { %v86_v26 = vmul.f32 0.125, %v85_v23  ;;  %vm87_vm9 = vcmp.gt.f32.partialorder %v85_v23, 1.0 }
 0x1dd   :  { %v486_v20 = vsel %vm87_vm9, 1.0, %v554_v3 }
 0x1de   :  { %v90_v32 = vmul.f32 %v486_v20, %v86_v26 }
 0x1e0   :  { %v111_v37 = vperm.slane %v90_v32, 0  ;;  %v129_v38 = vperm.slane %v90_v32, 1  ;;  %v147_v0 = vperm.slane %v90_v32, 2 }
 0x1e2   :  { %v112_v41 = vmul.f32 %v111_v37, %v110_v35  ;;  %v130_v45 = vmul.f32 %v129_v38, %v128_v40  ;;  %v148_v48 = vmul.f32 %v147_v0, %v146_v42 }
 0x1e3   :  { %v420_v43 = vpop.xlane.xlu2 %419 }
 0x1e4   :  { %v113_v46 = vadd.f32 1.0, %v112_v41  ;;  %v421_v63 = vsub.f32 %v691_v31, %v420_v43  ;;  %v496_v31 = vsel %vm425_vm15, 1.0, %v554_v3  ;;  %v55_v3 = vsel %vm37_vm6, %v54_v21, 0.0 }
 0x1e5   :  { %v428_v9 = vmul.f32 %v496_v31, %v712_v51 }
 0x1e6   :  { %v131_v47 = vadd.f32 %v130_v45, %v113_v46 }
 0x1e7   :  { %v438_v13 = vsel %vm349_vm3, %v428_v9, 0.0 }
 0x1e8   :  { %v149_v22 = vadd.f32 %v148_v48, %v131_v47  ;;  %439 = vadd.xlane.f32.xlu1 %v438_v13 }
 0x1ea   :  { %v150_v50 = vmul.f32 0.33333334, %v149_v22 }
 0x1eb   :  { %v733_v53 = vpop.xlane.xlu2 %39 }
 0x1ec   :  { %v152_v54 = vmul.f32 5.0, %v150_v50  ;;  %vm153_vm12 = vcmp.lt.f32.partialorder %v150_v50, 1.0  ;;  %v154_v55 = vmul.f32 0.2, %v150_v50  ;;  %v41_v56 = vsub.f32 %v698_v1, %v733_v53 }
 0x1ed   :  { %vm151_vm13 = vcmp.gt.f32.partialorder %v150_v50, 1.0 }
 0x1ee   :  { %v155_v58 = vsel %vm153_vm12, %v154_v55, %v150_v50  ;;  %v42_v61 = vmul.f32 1.442695, %v41_v56 }
 0x1ef   :  { %v156_v59 = vsel %vm151_vm13, %v152_v54, %v155_v58 }
 0x1f0   :  { %v306_v62 = vmul.f32 %v305_v60, %v156_v59  ;;  %544 = vpow2.f32 %v42_v61 }
 0x1f2   :  { %v422_v2 = vmul.f32 %v421_v63, %v306_v62 }
 0x1f4   :  { %v429_v5 = vmul.f32 1.442695, %v422_v2 }
 0x1f6   :  { %546 = vpow2.f32 %v429_v5  ;;  %v545_v6 = vpop.eup %544 }
 0x1f7   :  { %v44_v7 = vsel %vm37_vm6, %v545_v6, 0.0 }
 0x1f8   :  { %45 = vadd.xlane.f32.xlu2 %v44_v7 }
 0x1fc   :  { %v547_v8 = vpop.eup %546 }
 0x1fd   :  { %v431_v10 = vmul.f32 %v547_v8, %v712_v51 }
 0x1ff   :  { %v432_v11 = vsel %vm349_vm3, %v431_v10, 0.0 }
 0x200   :  { %433 = vadd.xlane.f32.xlu0 %v432_v11 }
 0x25b   :  { %v440_v51 = vpop.xlane.xlu1 %439 }
 0x25c   :  { %vm441_vm4 = vcmp.lt.f32.partialorder %v440_v51, 1e-06 }
 0x25d   :  { %v442_v23 = vsel %vm441_vm4, 1.0, %v440_v51 }
 0x25e   :  { %vm452_vm5 = vweird.f32 %v442_v23  ;;  %v458_v30 = vand.u32 2147483648, %v442_v23  ;;  %v456_v1 = vand.u32 2147483647, %v442_v23 }
 0x260   :  { %v459_v28 = vor.u32 1.1754944e-38, %v458_v30  ;;  %vm457_vm6 = vcmp.eq.f32.partialorder %v456_v1, 8.507059e+37 }
 0x26b   :  { %v46_v26 = vpop.xlane.xlu2 %45 }
 0x273   :  { %v434_v14 = vpop.xlane.xlu0 %433 }
 0x274   :  { %548 = vlog2.f32 %v434_v14 }
 0x275   :  { %550 = vrcp.f32 %v442_v23 }
 0x276   :  { %552 = vlog2.f32 %v46_v26 }
 0x27a   :  { %v549_v15 = vpop.eup %548 }
 0x27b   :  { %v436_v16 = vmul.f32 0.6931472, %v549_v15  ;;  %v551_v24 = vpop.eup %550 }
 0x27c   :  { %v448_v25 = vmul.f32 %v551_v24, %v442_v23  ;;  %v553_v29 = vpop.eup %552 }
 0x27d   :  { %v437_v17 = vsub.f32 %v422_v2, %v436_v16  ;;  %v48_v34 = vmul.f32 0.6931472, %v553_v29 }
 0x27e   :  { %v449_v27 = vsub.f32 1.0, %v448_v25 }
 0x27f   :  { %v443_v18 = vmul.f32 %v437_v17, %v428_v9  ;;  %v49_v36 = vadd.f32 %v48_v34, %v733_v53 }
 0x280   :  { %v450_v20 = vmul.f32 %v551_v24, %v449_v27 }
 0x281   :  { %v444_v19 = vsel %vm349_vm3, %v443_v18, 0.0  ;;  %vm453_vm3 = vweird.f32 %v551_v24 }
 0x282   :  { %445 = vadd.xlane.f32.xlu2 %v444_v19  ;;  %v451_v33 = vadd.f32 %v551_v24, %v450_v20  ;;  %vm454_vm0 = vmor %vm452_vm5, %vm453_vm3 }
 0x284   :  { %v455_v35 = vsel %vm454_vm0, %v551_v24, %v451_v33 }
 0x285   :  { %v460_v37 = vsel %vm457_vm6, %v459_v28, %v455_v35 }
 0x28a   :  { %56 = vadd.xlane.f32.xlu2 %v55_v3 }
 0x2f5   :  { %v446_v32 = vpop.xlane.xlu2 %445 }
 0x2f6   :  { %v461_v41 = vmul.f32 %v460_v37, %v446_v32 }
 0x2f8   :  { %v462_v42 = vmul.f32 -1.4285715, %v461_v41 }
 0x2fa   :  { %v463_v43 = vsel %vm59_vm2, %v462_v42, 0.0 }
 0x2fd   :  { %v57_v38 = vpop.xlane.xlu2 %56 }
 0x2fe   :  { %v58_v40 = vsub.f32 %v49_v36, %v57_v38 }
 0x300   :  { %v60_v0 = vsel %vm59_vm2, %v58_v40, 0.0 }
 0x301   :  { %61 = vadd.xlane.f32.xlu2 %v60_v0 }
 0x309   :  { %464 = vadd.xlane.f32.xlu2 %v463_v43 }
 0x374   :  { %v62_v44 = vpop.xlane.xlu2 %61 }
 0x375   :  { %v63_v45 = vrot.slane %v62_v44, 4 }
 0x377   :  { %v64_v46 = vadd.f32 %v63_v45, %v62_v44 }
 0x379   :  { %v65_v47 = vrot.slane %v64_v46, 2 }
 0x37b   :  { %v66_v48 = vadd.f32 %v65_v47, %v64_v46 }
 0x37c   :  { %v465_v22 = vpop.xlane.xlu2 %464 }
 0x37d   :  { %v466_v49 = vrot.slane %v465_v22, 4  ;;  %v67_v50 = vrot.slane %v66_v48, 1 }
 0x37f   :  { %v467_v52 = vadd.f32 %v466_v49, %v465_v22  ;;  %v68_v53 = vadd.f32 %v67_v50, %v66_v48 }
 0x381   :  { %v468_v54 = vrot.slane %v467_v52, 2  ;;  %497 = vpush %v68_v53 }
 0x383   :  { %v469_v55 = vadd.f32 %v468_v54, %v467_v52 }
 0x385   :  { %v470_v4 = vrot.slane %v469_v55, 1 }
 0x387   :  { %v471_v56 = vadd.f32 %v470_v4, %v469_v55 }
 0x389   :  { %499 = vpush %v471_v56 }
 0x3b2   :  { %s498_s2 = spop %497 }
 0x3b3   :  { %v477_v59 = vstv %s498_s2 }
 0x3ba   :  { %s500_s25 = spop %499 }
 0x3bb   :  { %v475_v58 = vstv %s500_s25 }
 0x3bc   :  { %v476_v60 = vsel %vm474_vm7, %v475_v58, 0.0 }
 0x3bd   :  { %v478_v61 = vsel %vm473_vm8, %v477_v59, %v476_v60 }
 0x3be   :  { %479 = vst [vmem:[%s766_s9] sm:$0x1] %v478_v61 }

</bundles_post_ra>
